<compile_context>
chip_gen: v7x
topology: tpu7x:2x2x1
jax: 0.10.0
libtpu: 0.0.40
codegen_flags: <defaults>
</compile_context>

<pallas_src>
import functools

import jax
import jax.numpy as jnp
from jax.experimental import pallas as pl
from jax.experimental.pallas import tpu as pltpu


def _round_up(v, m):
    return ((v + m - 1) // m) * m


# ---------------------------------------------------------------------------
# Kernel
# ---------------------------------------------------------------------------
def mlp_kernel(x_ref, w1_ref, b1_ref, w2_ref, b2_ref, w3_ref, b3_ref, o_ref,
               xpad_ref, *, in_dim, compute_dtype):
    # Zero-pad x's feature dim (in_dim -> k_pad) on-chip.  Exact for a linear layer
    # because the extra w1 rows are zero.  Whole-tile memset + masked partial store
    # are VMEM-local and cheap; no padded copy of x ever touches HBM.
    xpad_ref[...] = jnp.zeros_like(xpad_ref)
    xpad_ref[:, :in_dim] = x_ref[...].astype(compute_dtype)

    # fc1 + relu  (bf16 (or f32) operands on the MXU, f32 accumulation; bias+relu on VPU in f32)
    h1 = jnp.dot(xpad_ref[...], w1_ref[...], preferred_element_type=jnp.float32)
    h1 = jnp.maximum(h1 + b1_ref[...], 0.0).astype(compute_dtype)
    # fc2 + relu
    h2 = jnp.dot(h1, w2_ref[...], preferred_element_type=jnp.float32)
    h2 = jnp.maximum(h2 + b2_ref[...], 0.0).astype(compute_dtype)
    # out: logits over the padded action dim; the real logits are the first 52 lanes.
    o_ref[...] = (jnp.dot(h2, w3_ref[...], preferred_element_type=jnp.float32)
                  + b3_ref[...]).astype(o_ref.dtype)


# ---------------------------------------------------------------------------
# Wrapper
# ---------------------------------------------------------------------------
def policy_network_forward(x, params, *, out_dim=52, grid_steps=2, max_tile_b=1024):
    """Fused PolicyNetwork forward.

    x: (B, input_dim) float32.
    params: (w1, b1, w2, b2, w3, b3) as produced by init_params (already padded and
        stored in the compute dtype):
          w1: (k_pad, hidden)   b1: (1, hidden) f32
          w2: (hidden, hidden)  b2: (1, hidden) f32
          w3: (hidden, n_pad)   b3: (1, n_pad) f32
    grid_steps: minimum number of batch tiles.  2 (default) keeps both v7x TensorCores
        fed; use 1 on single-TC v5e/v6e at small batch to avoid per-step overhead.
    """
    w1, b1, w2, b2, w3, b3 = params
    k_pad, hidden = w1.shape
    n_pad = w3.shape[1]
    B, in_dim = x.shape
    assert in_dim <= k_pad, (in_dim, k_pad)
    compute_dtype = w1.dtype  # weights are pre-cast; kernel compute dtype follows them

    # Batch tiling: round tile to 128 rows (lane/sublane friendly for f32 and bf16).
    tile_b = min(max_tile_b, max(128, _round_up(pl.cdiv(B, grid_steps), 128)))
    num_steps = max(grid_steps, pl.cdiv(B, tile_b))
    b_pad = num_steps * tile_b
    if b_pad != B:
        x = jnp.pad(x, ((0, b_pad - B), (0, 0)))

    itemsize = jnp.dtype(compute_dtype).itemsize
    bytes_accessed = (x.size * x.dtype.itemsize
                      + (w1.size + w2.size + w3.size) * itemsize
                      + (b1.size + b2.size + b3.size) * 4
                      + b_pad * n_pad * 4)
    flops = 2 * b_pad * (k_pad * hidden + hidden * hidden + hidden * n_pad)

    kernel = functools.partial(mlp_kernel, in_dim=in_dim, compute_dtype=compute_dtype)

    # Constant index_map -> single buffer for the VMEM-resident operands.
    resident = dict(pipeline_mode=pl.Buffered(1))

    out = pl.pallas_call(
        kernel,
        out_shape=jax.ShapeDtypeStruct((b_pad, n_pad), jnp.float32),
        grid_spec=pltpu.PrefetchScalarGridSpec(
            num_scalar_prefetch=0,
            grid=(num_steps,),
            in_specs=[
                # streamed batch tile of x (unpadded feature dim; K-pad happens in VMEM)
                pl.BlockSpec((tile_b, in_dim), lambda i: (i, 0)),
                # weights / biases: VMEM-resident, same block every grid step
                pl.BlockSpec((k_pad, hidden), lambda i: (0, 0), **resident),
                pl.BlockSpec((1, hidden), lambda i: (0, 0), **resident),
                pl.BlockSpec((hidden, hidden), lambda i: (0, 0), **resident),
                pl.BlockSpec((1, hidden), lambda i: (0, 0), **resident),
                pl.BlockSpec((hidden, n_pad), lambda i: (0, 0), **resident),
                pl.BlockSpec((1, n_pad), lambda i: (0, 0), **resident),
            ],
            out_specs=pl.BlockSpec((tile_b, n_pad), lambda i: (i, 0)),
            scratch_shapes=[pltpu.VMEM((tile_b, k_pad), compute_dtype)],
        ),
        compiler_params=pltpu.CompilerParams(
            dimension_semantics=("parallel",),   # shard batch tiles across TCs (v7x)
        ),
        cost_estimate=pl.CostEstimate(
            flops=flops, transcendentals=0, bytes_accessed=bytes_accessed),
    )(x, w1, b1, w2, b2, w3, b3)

    return out[:B, :out_dim]


# ---------------------------------------------------------------------------
# Params: PyTorch nn.Linear-style init, then one-time pad + cast to compute dtype
# ---------------------------------------------------------------------------
def init_params(key, input_dim=161, hidden_dim=256, output_dim=52,
                k_pad=256, n_pad=128, param_dtype=jnp.bfloat16):
    ks = jax.random.split(key, 6)

    def linear(kw, kb, fan_in, fan_out):
        bound = 1.0 / jnp.sqrt(fan_in)
        w = jax.random.uniform(kw, (fan_in, fan_out), jnp.float32, -bound, bound)
        b = jax.random.uniform(kb, (1, fan_out), jnp.float32, -bound, bound)
        return w, b

    w1, b1 = linear(ks[0], ks[1], input_dim, hidden_dim)
    w2, b2 = linear(ks[2], ks[3], hidden_dim, hidden_dim)
    w3, b3 = linear(ks[4], ks[5], hidden_dim, output_dim)
    raw = (w1, b1, w2, b2, w3, b3)

    # Zero padding is numerically exact: extra K rows multiply zero features, extra N
    # columns are sliced off in the wrapper.  Cast AFTER padding (bf16 zero is exact).
    # TODO(synk): optional int8 (v5e/v6e) / fp8-e4m3 (v7x) weight path with per-channel
    # scales folded into the f32 epilogue; not implemented here.
    w1p = jnp.pad(w1, ((0, k_pad - input_dim), (0, 0))).astype(param_dtype)
    w2p = w2.astype(param_dtype)
    w3p = jnp.pad(w3, ((0, 0), (0, n_pad - output_dim))).astype(param_dtype)
    b3p = jnp.pad(b3, ((0, 0), (0, n_pad - output_dim)))   # biases stay f32
    prepared = (w1p, b1, w2p, b2, w3p, b3p)
    return raw, prepared


# ---------------------------------------------------------------------------
# Main
# ---------------------------------------------------------------------------
if __name__ == "__main__":
    key = jax.random.PRNGKey(0)
    k_x, k_p = jax.random.split(key)

    INPUT_DIM, HIDDEN_DIM, OUTPUT_DIM = 161, 256, 52
    B = 200   # padded to 2 x 128-row tiles -> exercises tiling, batch pad and in-kernel K pad

    x = jax.random.normal(k_x, (B, INPUT_DIM), jnp.float32)

    # --- default path: bf16 weights/activations, f32 accumulation ---
    raw, params_bf16 = init_params(k_p, INPUT_DIM, HIDDEN_DIM, OUTPUT_DIM,
                                   param_dtype=jnp.bfloat16)
    w1, b1, w2, b2, w3, b3 = raw

    def ref_bf16(x):
        c = jnp.bfloat16
        h1 = jnp.maximum(jnp.dot(x.astype(c), w1.astype(c),
                                 preferred_element_type=jnp.float32) + b1, 0.0)
        h2 = jnp.maximum(jnp.dot(h1.astype(c), w2.astype(c),
                                 preferred_element_type=jnp.float32) + b2, 0.0)
        return jnp.dot(h2.astype(c), w3.astype(c),
                       preferred_element_type=jnp.float32) + b3

    logits = policy_network_forward(x, params_bf16, out_dim=OUTPUT_DIM, grid_steps=2)
    logits = jax.block_until_ready(logits)
    assert logits.shape == (B, OUTPUT_DIM), logits.shape
    assert jnp.allclose(logits, ref_bf16(x), atol=2e-2, rtol=2e-2), \
        "bf16 path mismatch vs bf16 reference"

    # --- opt-in f32 parity path (matches the PyTorch module's f32 forward) ---
    _, params_f32 = init_params(k_p, INPUT_DIM, HIDDEN_DIM, OUTPUT_DIM,
                                param_dtype=jnp.float32)

    def ref_f32(x):
        h1 = jnp.maximum(x @ w1 + b1, 0.0)
        h2 = jnp.maximum(h1 @ w2 + b2, 0.0)
        return h2 @ w3 + b3

    logits_f32 = policy_network_forward(x, params_f32, out_dim=OUTPUT_DIM, grid_steps=1)
    logits_f32 = jax.block_until_ready(logits_f32)
    assert logits_f32.shape == (B, OUTPUT_DIM), logits_f32.shape
    assert jnp.allclose(logits_f32, ref_f32(x), atol=1e-3, rtol=1e-3), \
        "f32 path mismatch vs f32 reference"

    print("KERNEL_OK")
</pallas_src>

<mosaic_0001>
module attributes {stable_mosaic.version = 11 : i64} {
  func.func @mlp_kernel(%arg0: i32, %arg1: memref<128x161xf32, #tpu.memory_space<vmem>>, %arg2: memref<256x256xbf16, #tpu.memory_space<vmem>>, %arg3: memref<1x256xf32, #tpu.memory_space<vmem>>, %arg4: memref<256x256xbf16, #tpu.memory_space<vmem>>, %arg5: memref<1x256xf32, #tpu.memory_space<vmem>>, %arg6: memref<256x128xbf16, #tpu.memory_space<vmem>>, %arg7: memref<1x128xf32, #tpu.memory_space<vmem>>, %arg8: memref<128x128xf32, #tpu.memory_space<vmem>>, %arg9: memref<128x256xbf16, #tpu.memory_space<vmem>>) attributes {dimension_semantics = [#tpu.dimension_semantics<parallel>], iteration_bounds = array<i64: 2>, scalar_prefetch = 0 : i64, scratch_operands = 1 : i64, tpu.core_type = #tpu.core_type<tc>, window_params = [{transform_indices = @transform_0, window_bounds = array<i64: 128, 161>}, {pipeline_mode = #tpu.pipeline_mode<synchronous>, transform_indices = @transform_1, window_bounds = array<i64: 256, 256>}, {pipeline_mode = #tpu.pipeline_mode<synchronous>, transform_indices = @transform_2, window_bounds = array<i64: 1, 256>}, {pipeline_mode = #tpu.pipeline_mode<synchronous>, transform_indices = @transform_3, window_bounds = array<i64: 256, 256>}, {pipeline_mode = #tpu.pipeline_mode<synchronous>, transform_indices = @transform_4, window_bounds = array<i64: 1, 256>}, {pipeline_mode = #tpu.pipeline_mode<synchronous>, transform_indices = @transform_5, window_bounds = array<i64: 256, 128>}, {pipeline_mode = #tpu.pipeline_mode<synchronous>, transform_indices = @transform_6, window_bounds = array<i64: 1, 128>}, {transform_indices = @transform_7, window_bounds = array<i64: 128, 128>}]} {
    %cst = arith.constant 0.000000e+00 : bf16
    %0 = vector.broadcast %cst : bf16 to vector<128x256xbf16>
    %c0 = arith.constant 0 : index
    %c0_0 = arith.constant 0 : index
    %1 = vector.load %arg9[%c0, %c0_0] : memref<128x256xbf16, #tpu.memory_space<vmem>>, vector<128x256xbf16>
    tpu.vector_store %arg9[%c0, %c0_0], %0 {strides = array<i32>} : memref<128x256xbf16, #tpu.memory_space<vmem>>, vector<128x256xbf16>,
    %c0_1 = arith.constant 0 : index
    %c0_2 = arith.constant 0 : index
    %2 = vector.load %arg1[%c0_1, %c0_2] : memref<128x161xf32, #tpu.memory_space<vmem>>, vector<128x161xf32>
    %3 = arith.truncf %2 : vector<128x161xf32> to vector<128x161xbf16>
    %c0_3 = arith.constant 0 : index
    %c0_4 = arith.constant 0 : index
    %4 = vector.load %arg9[%c0_3, %c0_4] : memref<128x256xbf16, #tpu.memory_space<vmem>>, vector<128x161xbf16>
    tpu.vector_store %arg9[%c0_3, %c0_4], %3 {strides = array<i32>} : memref<128x256xbf16, #tpu.memory_space<vmem>>, vector<128x161xbf16>,
    %c0_5 = arith.constant 0 : index
    %c0_6 = arith.constant 0 : index
    %5 = vector.load %arg9[%c0_5, %c0_6] : memref<128x256xbf16, #tpu.memory_space<vmem>>, vector<128x256xbf16>
    %c0_7 = arith.constant 0 : index
    %c0_8 = arith.constant 0 : index
    %6 = vector.load %arg2[%c0_7, %c0_8] : memref<256x256xbf16, #tpu.memory_space<vmem>>, vector<256x256xbf16>
    %cst_9 = arith.constant dense<0.000000e+00> : vector<128x256xf32>
    %7 = tpu.matmul %5, %6, %cst_9 {dimension_numbers = #tpu.dot_dimension_numbers<[1], [0], [0], [1], [0, 0, 1, 1], [], []>} : vector<128x256xbf16>, vector<256x256xbf16>, vector<128x256xf32> -> vector<128x256xf32>
    %c0_10 = arith.constant 0 : index
    %c0_11 = arith.constant 0 : index
    %8 = vector.load %arg3[%c0_10, %c0_11] : memref<1x256xf32, #tpu.memory_space<vmem>>, vector<1x256xf32>
    %9 = vector.broadcast %8 : vector<1x256xf32> to vector<128x256xf32>
    %10 = arith.addf %7, %9 : vector<128x256xf32>
    %cst_12 = arith.constant 0.000000e+00 : f32
    %11 = vector.broadcast %cst_12 : f32 to vector<128x256xf32>
    %12 = arith.maximumf %10, %11 : vector<128x256xf32>
    %13 = arith.truncf %12 : vector<128x256xf32> to vector<128x256xbf16>
    %c0_13 = arith.constant 0 : index
    %c0_14 = arith.constant 0 : index
    %14 = vector.load %arg4[%c0_13, %c0_14] : memref<256x256xbf16, #tpu.memory_space<vmem>>, vector<256x256xbf16>
    %cst_15 = arith.constant dense<0.000000e+00> : vector<128x256xf32>
    %15 = tpu.matmul %13, %14, %cst_15 {dimension_numbers = #tpu.dot_dimension_numbers<[1], [0], [0], [1], [0, 0, 1, 1], [], []>} : vector<128x256xbf16>, vector<256x256xbf16>, vector<128x256xf32> -> vector<128x256xf32>
    %c0_16 = arith.constant 0 : index
    %c0_17 = arith.constant 0 : index
    %16 = vector.load %arg5[%c0_16, %c0_17] : memref<1x256xf32, #tpu.memory_space<vmem>>, vector<1x256xf32>
    %17 = vector.broadcast %16 : vector<1x256xf32> to vector<128x256xf32>
    %18 = arith.addf %15, %17 : vector<128x256xf32>
    %cst_18 = arith.constant 0.000000e+00 : f32
    %19 = vector.broadcast %cst_18 : f32 to vector<128x256xf32>
    %20 = arith.maximumf %18, %19 : vector<128x256xf32>
    %21 = arith.truncf %20 : vector<128x256xf32> to vector<128x256xbf16>
    %c0_19 = arith.constant 0 : index
    %c0_20 = arith.constant 0 : index
    %22 = vector.load %arg6[%c0_19, %c0_20] : memref<256x128xbf16, #tpu.memory_space<vmem>>, vector<256x128xbf16>
    %cst_21 = arith.constant dense<0.000000e+00> : vector<128x128xf32>
    %23 = tpu.matmul %21, %22, %cst_21 {dimension_numbers = #tpu.dot_dimension_numbers<[1], [0], [0], [1], [0, 0, 1, 1], [], []>} : vector<128x256xbf16>, vector<256x128xbf16>, vector<128x128xf32> -> vector<128x128xf32>
    %c0_22 = arith.constant 0 : index
    %c0_23 = arith.constant 0 : index
    %24 = vector.load %arg7[%c0_22, %c0_23] : memref<1x128xf32, #tpu.memory_space<vmem>>, vector<1x128xf32>
    %25 = vector.broadcast %24 : vector<1x128xf32> to vector<128x128xf32>
    %26 = arith.addf %23, %25 : vector<128x128xf32>
    %c0_24 = arith.constant 0 : index
    %c0_25 = arith.constant 0 : index
    %27 = vector.load %arg8[%c0_24, %c0_25] : memref<128x128xf32, #tpu.memory_space<vmem>>, vector<128x128xf32>
    tpu.vector_store %arg8[%c0_24, %c0_25], %26 {strides = array<i32>} : memref<128x128xf32, #tpu.memory_space<vmem>>, vector<128x128xf32>,
    return
  }
  func.func @transform_0(%arg0: i32) -> (i32, i32) {
    %c0_i32 = arith.constant 0 : i32
    %c0_i32_0 = arith.constant 0 : i32
    return %arg0, %c0_i32 : i32, i32
  }
  func.func @transform_1(%arg0: i32) -> (i32, i32) {
    %c0_i32 = arith.constant 0 : i32
    %c0_i32_0 = arith.constant 0 : i32
    %c0_i32_1 = arith.constant 0 : i32
    return %c0_i32, %c0_i32_0 : i32, i32
  }
  func.func @transform_2(%arg0: i32) -> (i32, i32) {
    %c0_i32 = arith.constant 0 : i32
    %c0_i32_0 = arith.constant 0 : i32
    %c0_i32_1 = arith.constant 0 : i32
    return %c0_i32, %c0_i32_0 : i32, i32
  }
  func.func @transform_3(%arg0: i32) -> (i32, i32) {
    %c0_i32 = arith.constant 0 : i32
    %c0_i32_0 = arith.constant 0 : i32
    %c0_i32_1 = arith.constant 0 : i32
    return %c0_i32, %c0_i32_0 : i32, i32
  }
  func.func @transform_4(%arg0: i32) -> (i32, i32) {
    %c0_i32 = arith.constant 0 : i32
    %c0_i32_0 = arith.constant 0 : i32
    %c0_i32_1 = arith.constant 0 : i32
    return %c0_i32, %c0_i32_0 : i32, i32
  }
  func.func @transform_5(%arg0: i32) -> (i32, i32) {
    %c0_i32 = arith.constant 0 : i32
    %c0_i32_0 = arith.constant 0 : i32
    %c0_i32_1 = arith.constant 0 : i32
    return %c0_i32, %c0_i32_0 : i32, i32
  }
  func.func @transform_6(%arg0: i32) -> (i32, i32) {
    %c0_i32 = arith.constant 0 : i32
    %c0_i32_0 = arith.constant 0 : i32
    %c0_i32_1 = arith.constant 0 : i32
    return %c0_i32, %c0_i32_0 : i32, i32
  }
  func.func @transform_7(%arg0: i32) -> (i32, i32) {
    %c0_i32 = arith.constant 0 : i32
    %c0_i32_0 = arith.constant 0 : i32
    return %arg0, %c0_i32 : i32, i32
  }
}

</mosaic_0001>

<bundles_post_ra>
// kernel: tpu_custom_call.1
= control target key start
LH: loop header
LB: loop body
LE: loop exit
PB: predicated region body
PF: predicated region fallthrough
CT: control target
= control target key end

     0   :  { %12 = vsyncpa [#allocation4], 0  ;;  %s2487_s0 = inlined_call_operand.vmem [shape: f32[256,161], index: 0, kind: input, shape index: {}]   ;;  %s2488_s1 = inlined_call_operand.vmem [shape: bf16[256,256], index: 1, kind: input, shape index: {}]   ;;  %s2489_s2 = inlined_call_operand.vmem [shape: f32[1,256], index: 2, kind: input, shape index: {}]   ;;  %s2490_s3 = inlined_call_operand.vmem [shape: bf16[256,256], index: 3, kind: input, shape index: {}]   ;;  %s2491_s4 = inlined_call_operand.vmem [shape: f32[1,256], index: 4, kind: input, shape index: {}]   ;;  %s2492_s5 = inlined_call_operand.vmem [shape: bf16[256,128], index: 5, kind: input, shape index: {}]   ;;  %s2493_s6 = inlined_call_operand.vmem [shape: f32[1,128], index: 6, kind: input, shape index: {}]   ;;  %s2494_s7 = inlined_call_operand.hbm [shape: f32[256,128], index: 7, kind: output, shape index: {}]  }
   0x1   :  { %14 = vsyncpa [#allocation4 + $0x1], 0  ;;  %s1873_s24 = smov 0   ;;  %s1875_s25 = smov 0  }
   0x2   :  { %s1877_s26 = smov 0   ;;  %s1879_s27 = smov 0  }
   0x3 LB: > { %s1894_s28 = sadd.s32 4294967295, %s1827_s27   ;;  %s1435_s29 = sadd.s32 4294967294, %s1827_s27   ;;  %s1827_s27 = sphi %s1879_s27, %s2500_s27   ;;  %s1823_s26 = sphi %s1877_s26, %s2499_s26   ;;  %s1819_s25 = sphi %s1875_s25, %s2498_s25   ;;  %s1815_s24 = sphi %s1873_s24, %s2497_s24  }
   0x4   : > { %s1898_s30 = sadd.s32 1, %s1827_s27   ;;  %s179_s8 = sadd.s32 1, %s1823_s26 }
   0x5   : > { %s176_s9 = ssub.s32 %s1827_s27, %s1898_s30  ;;  %p189_p0 = scmp.ne.s32.totalorder %s1823_s26, %s1819_s25 }
   0x6   : > { %p177_p1 = scmp.eq.s32.totalorder %s176_s9, 0  ;;  %p190_p2 = scmp.eq.s32.totalorder %s1894_s28, 1 }
   0x7   : > { %p195_p3 = scmp.ne.s32.totalorder %s1819_s25, %s1815_s24  ;;  %p196_p4 = scmp.eq.s32.totalorder %s1435_s29, 1 }
   0x8   : > { %s1909_s10 = scalar_select %p177_p1, %s1823_s26, %s179_s8  }
   0x9   : > { %p1911_p5 = por %p190_p2, %p189_p0  ;;  %p1915_p6 = por %p196_p4, %p195_p3 }
   0xa   : > { %p1438_p7 = scmp.ge.s32.totalorder %s1827_s27, 1  ;;  %p242_p8 = scmp.lt.s32.totalorder %s1827_s27, 3 }
   0xc   : > { %p243_p9 = pnand %p1438_p7, %p242_p8 }
   0xd   : > { %v1653_v0 = vld [vmem:[%s2488_s1 + $0x4] ss:$8 sps:$4 sm:$0xff] (!%p243_p9)   ;;  %v1655_v1 = vld [vmem:[%s2488_s1] ss:$8 sps:$4 sm:$0xff] (!%p243_p9)   ;;  %v1829_v2 = vmov (!%p243_p9), 0   ;;  %s1440_s23 = sshll.u32 (!%p243_p9), %s1894_s28, 4 }
   0xe   : > { %246 = sbr.rel (%p243_p9) target bundleno = 812 (0x32c), region = 48  ;;  %285 = vst [vmem:[#allocation2 + $0x8] sm:$0xff] (!%p243_p9), %v1829_v2  ;;  %287 = vst [vmem:[#allocation2 + $0x18] sm:$0xff] (!%p243_p9), %v1829_v2  ;;  %585 = vmatprep.subr.bf16.mxu0 (!%p243_p9), %v1653_v0  ;;  %v1656_v3 = vld [vmem:[%s2488_s1 + $0x14] ss:$8 sps:$4 sm:$0xff] (!%p243_p9)   ;;  %p276_p10 = scmp.lt.s32.totalorder (!%p243_p9), %s1440_s23, 31 }
   0xf   : > { %289 = vst [vmem:[#allocation2 + $0x28] sm:$0xff] (!%p243_p9), %v1829_v2  ;;  %291 = vst [vmem:[#allocation2 + $0x38] sm:$0xff] (!%p243_p9), %v1829_v2  ;;  %586 = vmatpush1.bf16.msra.mxu0 (!%p243_p9), %v1655_v1  ;;  %v1658_v4 = vld [vmem:[%s2488_s1 + $0x10] ss:$8 sps:$4 sm:$0xff] (!%p243_p9)   ;;  %v1659_v5 = vld [vmem:[%s2488_s1 + $0x24] ss:$8 sps:$4 sm:$0xff] (!%p243_p9)  }
  0x10   : > { %293 = vst [vmem:[#allocation2 + $0x48] sm:$0xff] (!%p243_p9), %v1829_v2  ;;  %295 = vst [vmem:[#allocation2 + $0x58] sm:$0xff] (!%p243_p9), %v1829_v2  ;;  %587 = vmatprep.subr.bf16.mxu0 (!%p243_p9), %v1656_v3  ;;  %v1661_v6 = vld [vmem:[%s2488_s1 + $0x20] ss:$8 sps:$4 sm:$0xff] (!%p243_p9)   ;;  %v1662_v7 = vld [vmem:[%s2488_s1 + $0x34] ss:$8 sps:$4 sm:$0xff] (!%p243_p9)  }
  0x11   : > { %297 = vst [vmem:[#allocation2 + $0x68] sm:$0xff] (!%p243_p9), %v1829_v2  ;;  %299 = vst [vmem:[#allocation2 + $0x78] sm:$0xff] (!%p243_p9), %v1829_v2  ;;  %v1664_v8 = vld [vmem:[%s2488_s1 + $0x30] ss:$8 sps:$4 sm:$0xff] (!%p243_p9)   ;;  %v1665_v9 = vld [vmem:[%s2488_s1 + $0x44] ss:$8 sps:$4 sm:$0xff] (!%p243_p9)  }
  0x12   : > { %v1667_v10 = vld [vmem:[%s2488_s1 + $0x40] ss:$8 sps:$4 sm:$0xff] (!%p243_p9)   ;;  %v1668_v11 = vld [vmem:[%s2488_s1 + $0x54] ss:$8 sps:$4 sm:$0xff] (!%p243_p9)   ;;  %v1670_v12 = vld [vmem:[%s2488_s1 + $0x50] ss:$8 sps:$4 sm:$0xff] (!%p243_p9)  }
  0x13   : > { %588 = vmatpush1.bf16.msra.mxu0 (!%p243_p9), %v1658_v4  ;;  %v1671_v13 = vld [vmem:[%s2488_s1 + $0x64] ss:$8 sps:$4 sm:$0xff] (!%p243_p9)   ;;  %v1673_v14 = vld [vmem:[%s2488_s1 + $0x60] ss:$8 sps:$4 sm:$0xff] (!%p243_p9)   ;;  %vm349_vm0 = vcmask (!%p243_p9), 269312   ;;  %s272_s15 = sand.u32 (!%p243_p9), 1, %s1819_s25  }
  0x14   : > { %589 = vmatprep.subr.bf16.mxu0 (!%p243_p9), %v1659_v5  ;;  %v1674_v17 = vld [vmem:[%s2488_s1 + $0x74] ss:$8 sps:$4 sm:$0xff] (!%p243_p9)   ;;  %v1676_v31 = vld [vmem:[%s2488_s1 + $0x70] ss:$8 sps:$4 sm:$0xff] (!%p243_p9)   ;;  %v1677_v36 = vld [vmem:[%s2488_s1 + $0x84] ss:$8 sps:$4 sm:$0xff] (!%p243_p9)  }
  0x15   : > { %s2502_s23 = smov (!%p276_p10, %s1440_s23), 31  ;;  %v1679_v51 = vld [vmem:[%s2488_s1 + $0x80] ss:$8 sps:$4 sm:$0xff]   ;;  %v1680_v56 = vld [vmem:[%s2488_s1 + $0x94] ss:$8 sps:$4 sm:$0xff]   ;;  %s1439_s16 = sshll.u32 %s272_s15, 7 }
  0x16   : > { %s1529_s20 = sshll.u32 %s2502_s23, 4  ;;  %v1701_v5 = vld [vmem:[%s2490_s3 + $0x4] ss:$8 sps:$4 sm:$0xff]   ;;  %s2402_s19 = scalar_lea.vmem [#allocation3], %s1439_s16 }
  0x17   : > { %590 = vmatpush1.bf16.msra.mxu0 %v1661_v6  ;;  %s1958_s9 = scalar_lea.vmem %s2487_s0, %s1529_s20  ;;  %v1703_v6 = vld [vmem:[%s2490_s3] ss:$8 sps:$4 sm:$0xff]   ;;  %950 = vmatprep.subr.bf16.mxu1 %v1701_v5  ;;  %s1530_s20 = sshll.u32 %s1894_s28, 11 }
  0x18   : > { %591 = vmatprep.subr.bf16.mxu0 %v1662_v7  ;;  %v301_v15 = vld [vmem:[%s1958_s9 + $0x8] sm:$0xff]  ;;  %v303_v16 = vld [vmem:[%s1958_s9 + $0x18] sm:$0xff]  ;;  %v1975_v19 = vld [vmem:[%s1958_s9] sm:$0xff]  ;;  %951 = vmatpush1.bf16.msra.mxu1 %v1703_v6  ;;  %s2437_s29 = scalar_lea.hbm %s2494_s7, %s1530_s20  ;;  %s2446_s28 = scalar_lea.sflag [#allocation4], %s272_s15 }
  0x19   : > { %v333_v18 = vpack.c.bf16 %v303_v16, %v301_v15  ;;  %v1978_v20 = vld [vmem:[%s1958_s9 + $0x10] sm:$0xff]  ;;  %v305_v21 = vld [vmem:[%s1958_s9 + $0x28] sm:$0xff]  ;;  %v307_v23 = vld [vmem:[%s1958_s9 + $0x38] sm:$0xff]  ;;  %s1830_s13 = smov [#allocation3]  }
  0x1a   : > { %v332_v22 = vpack.c.bf16 %v1978_v20, %v1975_v19  ;;  %v1985_v24 = vld [vmem:[%s1958_s9 + $0x20] sm:$0xff]  ;;  %v1988_v25 = vld [vmem:[%s1958_s9 + $0x30] sm:$0xff]  ;;  %v335_v26 = vpack.c.bf16 %v307_v23, %v305_v21  ;;  %v309_v28 = vld [vmem:[%s1958_s9 + $0x48] sm:$0xff]  ;;  %s1769_s14 = sshll.u32 %s1830_s13, 4  ;;  %s1770_s14 = int_to_ptr.vmem [resolvable:$false] %s1769_s14 }
  0x1b   : > { %592 = vmatpush1.bf16.msra.mxu0 %v1664_v8  ;;  %350 = vst.msk [vmem:[#allocation2 + $0x8] sm:$0xff] %vm349_vm0, %v333_v18  ;;  %v334_v27 = vpack.c.bf16 %v1988_v25, %v1985_v24  ;;  %v311_v29 = vld [vmem:[%s1958_s9 + $0x58] sm:$0xff]  ;;  %v1996_v30 = vld [vmem:[%s1958_s9 + $0x40] sm:$0xff]  ;;  %v2002_v33 = vld [vmem:[%s1958_s9 + $0x50] sm:$0xff]  ;;  %s1771_s23 = scalar_lea.vmem %s1770_s14, 4096 }
  0x1c   : > { %593 = vmatprep.subr.bf16.mxu0 %v1665_v9  ;;  %v337_v32 = vpack.c.bf16 %v311_v29, %v309_v28  ;;  %v313_v34 = vld [vmem:[%s1958_s9 + $0x68] sm:$0xff]  ;;  %v315_v35 = vld [vmem:[%s1958_s9 + $0x78] sm:$0xff]  ;;  %352 = vst.msk [vmem:[#allocation2 + $0x18] sm:$0xff] %vm349_vm0, %v335_v26  ;;  %v336_v37 = vpack.c.bf16 %v2002_v33, %v1996_v30  ;;  %v2013_v39 = vld [vmem:[%s1958_s9 + $0x60] sm:$0xff] }
  0x1d   : > { %v339_v38 = vpack.c.bf16 %v315_v35, %v313_v34  ;;  %v2016_v40 = vld [vmem:[%s1958_s9 + $0x70] sm:$0xff]  ;;  %v317_v41 = vld [vmem:[%s1958_s9 + $0x88] sm:$0xff]  ;;  %v319_v43 = vld [vmem:[%s1958_s9 + $0x98] sm:$0xff] }
  0x1e   : > { %354 = vst.msk [vmem:[#allocation2 + $0x28] sm:$0xff] %vm349_vm0, %v337_v32  ;;  %v338_v42 = vpack.c.bf16 %v2016_v40, %v2013_v39  ;;  %v2024_v44 = vld [vmem:[%s1958_s9 + $0x80] sm:$0xff]  ;;  %v2027_v45 = vld [vmem:[%s1958_s9 + $0x90] sm:$0xff]  ;;  %v341_v46 = vpack.c.bf16 %v319_v43, %v317_v41  ;;  %v321_v48 = vld [vmem:[%s1958_s9 + $0xa8] sm:$0xff] }
  0x1f   : > { %594 = vmatpush1.bf16.msra.mxu0 %v1667_v10  ;;  %356 = vst.msk [vmem:[#allocation2 + $0x38] sm:$0xff] %vm349_vm0, %v339_v38  ;;  %v340_v47 = vpack.c.bf16 %v2027_v45, %v2024_v44  ;;  %v323_v49 = vld [vmem:[%s1958_s9 + $0xb8] sm:$0xff]  ;;  %v2035_v50 = vld [vmem:[%s1958_s9 + $0xa0] sm:$0xff]  ;;  %v2041_v53 = vld [vmem:[%s1958_s9 + $0xb0] sm:$0xff] }
  0x20   : > { %595 = vmatprep.subr.bf16.mxu0 %v1668_v11  ;;  %v343_v52 = vpack.c.bf16 %v323_v49, %v321_v48  ;;  %v325_v54 = vld [vmem:[%s1958_s9 + $0xc8] sm:$0xff]  ;;  %v327_v55 = vld [vmem:[%s1958_s9 + $0xd8] sm:$0xff]  ;;  %358 = vst.msk [vmem:[#allocation2 + $0x48] sm:$0xff] %vm349_vm0, %v341_v46  ;;  %v342_v57 = vpack.c.bf16 %v2041_v53, %v2035_v50  ;;  %v2052_v59 = vld [vmem:[%s1958_s9 + $0xc0] sm:$0xff] }
  0x21   : > { %v345_v58 = vpack.c.bf16 %v327_v55, %v325_v54  ;;  %v2055_v60 = vld [vmem:[%s1958_s9 + $0xd0] sm:$0xff]  ;;  %v329_v61 = vld [vmem:[%s1958_s9 + $0xe8] sm:$0xff]  ;;  %v331_v0 = vld [vmem:[%s1958_s9 + $0xf8] sm:$0xff] }
  0x22   : > { %v366_v62 = vld [vmem:[#allocation2 + $0x8] sm:$0xff]  ;;  %360 = vst.msk [vmem:[#allocation2 + $0x58] sm:$0xff] %vm349_vm0, %v343_v52  ;;  %v344_v63 = vpack.c.bf16 %v2055_v60, %v2052_v59  ;;  %v2063_v1 = vld [vmem:[%s1958_s9 + $0xe0] sm:$0xff]  ;;  %v347_v2 = vpack.c.bf16 %v331_v0, %v329_v61  ;;  %v2067_v3 = vld [vmem:[%s1958_s9 + $0xf0] sm:$0xff]  ;;  %s1373_s9 = sshll.u32 %s2402_s19, 4  ;;  %s2439_s9 = int_to_ptr.vmem [resolvable:$true] %s1373_s9 }
  0x23   : > { %596 = vmatpush1.bf16.msra.mxu0 %v1670_v12  ;;  %617 = vmatprep.mubr.bf16.mxu0 %v366_v62  ;;  %362 = vst.msk [vmem:[#allocation2 + $0x68] sm:$0xff] %vm349_vm0, %v345_v58  ;;  %v346_v4 = vpack.c.bf16 %v2067_v3, %v2063_v1  ;;  %v1682_v7 = vld [vmem:[%s2488_s1 + $0x90] ss:$8 sps:$4 sm:$0xff]   ;;  %v1683_v8 = vld [vmem:[%s2488_s1 + $0xa4] ss:$8 sps:$4 sm:$0xff]   ;;  %s1765_s8 = scalar_lea.vmem %s2439_s9, 2048  ;;  %p1772_p0 = scmp.lt.s32.totalorder %s2439_s9, %s1770_s14 }
  0x24   : > { %597 = vmatprep.subr.bf16.mxu0 %v1671_v13  ;;  %364 = vst.msk [vmem:[#allocation2 + $0x78] sm:$0xff] %vm349_vm0, %v347_v2  ;;  %v1704_v9 = vld [vmem:[%s2490_s3 + $0x14] ss:$8 sps:$4 sm:$0xff]   ;;  %v1706_v10 = vld [vmem:[%s2490_s3 + $0x10] ss:$8 sps:$4 sm:$0xff]   ;;  %v1749_v44 = vld [vmem:[%s2492_s5 + $0x40] sm:$0xff]   ;;  %p1766_p11 = scmp.ne.s32.totalorder %s2439_s9, %s1765_s8  ;;  %p1773_p1 = scmp.lt.s32.totalorder %s1771_s23, %s1765_s8 }
  0x25   : > { %952 = vmatprep.subr.bf16.mxu1 %v1704_v9  ;;  %v1707_v11 = vld [vmem:[%s2490_s3 + $0x24] ss:$8 sps:$4 sm:$0xff]   ;;  %v1685_v12 = vld [vmem:[%s2488_s1 + $0xa0] ss:$8 sps:$4 sm:$0xff]   ;;  %v1686_v13 = vld [vmem:[%s2488_s1 + $0xb4] ss:$8 sps:$4 sm:$0xff]  }
  0x26   : > { %953 = vmatpush1.bf16.msra.mxu1 %v1706_v10  ;;  %v1710_v15 = vld [vmem:[%s2490_s3 + $0x34] ss:$8 sps:$4 sm:$0xff]   ;;  %v1688_v16 = vld [vmem:[%s2488_s1 + $0xb0] ss:$8 sps:$4 sm:$0xff]   ;;  %v1713_v21 = vld [vmem:[%s2490_s3 + $0x44] ss:$8 sps:$4 sm:$0xff]   ;;  %p1767_p12 = pnand %p1766_p11, %p1911_p5  ;;  %p1774_p2 = por %p1773_p1, %p1772_p0 }
  0x27   : > { %598 = vmatpush1.bf16.msra.mxu0 %v1673_v14  ;;  %v1709_v14 = vld [vmem:[%s2490_s3 + $0x20] ss:$8 sps:$4 sm:$0xff]   ;;  %954 = vmatprep.subr.bf16.mxu1 %v1707_v11  ;;  %v1712_v18 = vld [vmem:[%s2490_s3 + $0x30] ss:$8 sps:$4 sm:$0xff]   ;;  %v1692_v26 = vld [vmem:[%s2488_s1 + $0xd4] ss:$8 sps:$4 sm:$0xff]  }
  0x28   : > { %599 = vmatprep.subr.bf16.mxu0 %v1674_v17  ;;  %v1689_v17 = vld [vmem:[%s2488_s1 + $0xc4] ss:$8 sps:$4 sm:$0xff]   ;;  %v1691_v23 = vld [vmem:[%s2488_s1 + $0xc0] ss:$8 sps:$4 sm:$0xff]   ;;  %v1716_v29 = vld [vmem:[%s2490_s3 + $0x54] ss:$8 sps:$4 sm:$0xff]   ;;  %p1768_p13 = pneg %p1767_p12 }
  0x29   : > { %v1715_v28 = vld [vmem:[%s2490_s3 + $0x40] ss:$8 sps:$4 sm:$0xff]   ;;  %v1695_v32 = vld [vmem:[%s2488_s1 + $0xe4] ss:$8 sps:$4 sm:$0xff]   ;;  %v1718_v34 = vld [vmem:[%s2490_s3 + $0x50] ss:$8 sps:$4 sm:$0xff]  }
  0x2a   : > { %955 = vmatpush1.bf16.msra.mxu1 %v1709_v14  ;;  %v1697_v35 = vld [vmem:[%s2488_s1 + $0xe0] ss:$8 sps:$4 sm:$0xff]   ;;  %v1698_v38 = vld [vmem:[%s2488_s1 + $0xf4] ss:$8 sps:$4 sm:$0xff]   ;;  %v1700_v46 = vld [vmem:[%s2488_s1 + $0xf0] ss:$8 sps:$4 sm:$0xff]   ;;  %p1775_p3 = pnand %p1774_p2, %p1768_p13 }
  0x2b   : > { %600 = vmatpush1.bf16.msra.mxu0 %v1676_v31  ;;  %956 = vmatprep.subr.bf16.mxu1 %v1710_v15  ;;  %v1694_v31 = vld [vmem:[%s2488_s1 + $0xd0] ss:$8 sps:$4 sm:$0xff]   ;;  %v1721_v41 = vld [vmem:[%s2490_s3 + $0x60] ss:$8 sps:$4 sm:$0xff]   ;;  %v1722_v43 = vld [vmem:[%s2490_s3 + $0x74] ss:$8 sps:$4 sm:$0xff]  }
  0x2c   : > { %601 = vmatprep.subr.bf16.mxu0 %v1677_v36  ;;  %v1719_v36 = vld [vmem:[%s2490_s3 + $0x64] ss:$8 sps:$4 sm:$0xff]   ;;  %v1724_v48 = vld [vmem:[%s2490_s3 + $0x70] ss:$8 sps:$4 sm:$0xff]   ;;  %v1727_v52 = vld [vmem:[%s2490_s3 + $0x80] ss:$8 sps:$4 sm:$0xff]  }
  0x2d   : > { %v1725_v49 = vld [vmem:[%s2490_s3 + $0x84] ss:$8 sps:$4 sm:$0xff]   ;;  %v1728_v54 = vld [vmem:[%s2490_s3 + $0x94] ss:$8 sps:$4 sm:$0xff]   ;;  %v1730_v55 = vld [vmem:[%s2490_s3 + $0x90] ss:$8 sps:$4 sm:$0xff]  }
  0x2e   : > { %957 = vmatpush1.bf16.msra.mxu1 %v1712_v18  ;;  %v370_v58 = vld [vmem:[#allocation2 + $0x28] sm:$0xff]  ;;  %v1734_v19 = vld [vmem:[%s2490_s3 + $0xb4] ss:$8 sps:$4 sm:$0xff]   ;;  %v1736_v20 = vld [vmem:[%s2490_s3 + $0xb0] ss:$8 sps:$4 sm:$0xff]  }
  0x2f   : > { %602 = vmatpush1.bf16.msra.mxu0 %v1679_v51  ;;  %958 = vmatprep.subr.bf16.mxu1 %v1713_v21  ;;  %v368_v51 = vld [vmem:[#allocation2 + $0x18] sm:$0xff]  ;;  %v1733_v61 = vld [vmem:[%s2490_s3 + $0xa0] ss:$8 sps:$4 sm:$0xff]   ;;  %v1753_v53 = vld [vmem:[%s2492_s5 + $0x50] sm:$0xff]  }
  0x30   : > { %603 = vmatprep.subr.bf16.mxu0 %v1680_v56  ;;  %v1731_v56 = vld [vmem:[%s2490_s3 + $0xa4] ss:$8 sps:$4 sm:$0xff]   ;;  %v372_v62 = vld [vmem:[#allocation2 + $0x38] sm:$0xff]  ;;  %v1739_v0 = vld [vmem:[%s2490_s3 + $0xc0] ss:$8 sps:$4 sm:$0xff]  }
  0x31   : > { %v1740_v24 = vld [vmem:[%s2490_s3 + $0xd4] ss:$8 sps:$4 sm:$0xff]   ;;  %v374_v25 = vld [vmem:[#allocation2 + $0x48] sm:$0xff]  ;;  %v1742_v33 = vld [vmem:[%s2490_s3 + $0xd0] ss:$8 sps:$4 sm:$0xff]  }
  0x32   : > { %959 = vmatpush1.bf16.msra.mxu1 %v1715_v28  ;;  %v378_v2 = vld [vmem:[#allocation2 + $0x68] sm:$0xff]  ;;  %v380_v30 = vld [vmem:[#allocation2 + $0x78] sm:$0xff]  ;;  %v1750_v45 = vld [vmem:[%s2492_s5] sm:$0xff]  }
  0x33   : > { %604 = vmatpush1.bf16.msra.mxu0 %v1682_v7  ;;  %960 = vmatprep.subr.bf16.mxu1 %v1716_v29  ;;  %v1745_v39 = vld [vmem:[%s2490_s3 + $0xe0] ss:$8 sps:$4 sm:$0xff]   ;;  %v1746_v40 = vld [vmem:[%s2490_s3 + $0xf4] ss:$8 sps:$4 sm:$0xff]  }
  0x34   : > { %605 = vmatprep.subr.bf16.mxu0 %v1683_v8  ;;  %v1752_v50 = vld [vmem:[%s2492_s5 + $0x8] sm:$0xff]   ;;  %v2254_v59 = vld [vmem:[%s2492_s5 + $0x58] sm:$0xff]   ;;  %v2272_v1 = vld [vmem:[%s2492_s5 + $0x20] sm:$0xff]  }
  0x35   : > { %v2260_v60 = vld [vmem:[%s2492_s5 + $0x18] sm:$0xff]   ;;  %v2278_v3 = vld [vmem:[%s2492_s5 + $0x68] sm:$0xff]   ;;  %v413_v7 = vld [vmem:[%s2489_s2] sm:$0x3] }
  0x36   : > { %961 = vmatpush1.bf16.msra.mxu1 %v1718_v34 }
  0x37   : > { %606 = vmatpush1.bf16.msra.mxu0 %v1685_v12  ;;  %962 = vmatprep.subr.bf16.mxu1 %v1719_v36 }
  0x38   : > { %607 = vmatprep.subr.bf16.mxu0 %v1686_v13 }
  0x3a   : > { %963 = vmatpush1.bf16.msra.mxu1 %v1721_v41 }
  0x3b   : > { %608 = vmatpush1.bf16.msra.mxu0 %v1688_v16  ;;  %964 = vmatprep.subr.bf16.mxu1 %v1722_v43 }
  0x3c   : > { %609 = vmatprep.subr.bf16.mxu0 %v1689_v17 }
  0x3e   : > { %965 = vmatpush1.bf16.msra.mxu1 %v1724_v48 }
  0x3f   : > { %610 = vmatpush1.bf16.msra.mxu0 %v1691_v23  ;;  %966 = vmatprep.subr.bf16.mxu1 %v1725_v49 }
  0x40   : > { %611 = vmatprep.subr.bf16.mxu0 %v1692_v26 }
  0x42   : > { %967 = vmatpush1.bf16.msra.mxu1 %v1727_v52 }
  0x43   : > { %612 = vmatpush1.bf16.msra.mxu0 %v1694_v31  ;;  %968 = vmatprep.subr.bf16.mxu1 %v1728_v54 }
  0x44   : > { %613 = vmatprep.subr.bf16.mxu0 %v1695_v32 }
  0x46   : > { %969 = vmatpush1.bf16.msra.mxu1 %v1730_v55 }
  0x47   : > { %614 = vmatpush1.bf16.msra.mxu0 %v1697_v35  ;;  %970 = vmatprep.subr.bf16.mxu1 %v1731_v56 }
  0x48   : > { %615 = vmatprep.subr.bf16.mxu0 %v1698_v38 }
  0x4a   : > { %971 = vmatpush1.bf16.msra.mxu1 %v1733_v61 }
  0x4b   : > { %616 = vmatpush1.bf16.msra.mxu0 %v1700_v46  ;;  %972 = vmatprep.subr.bf16.mxu1 %v1734_v19 }
  0x4c   : > { %1531 = vmatprep.subr.bf16.mxu0 %v1749_v44 }
  0x4e   : > { %618 = vmatmul.mubr.bf16.vlgmr.msra.gmra.mrb[0].mxu0 %v332_v22  ;;  %v1737_v22 = vld [vmem:[%s2490_s3 + $0xc4] ss:$8 sps:$4 sm:$0xff]   ;;  %973 = vmatpush1.bf16.msra.mxu1 %v1736_v20 }
  0x4f   : > { %627 = vmatprep.mubr.bf16.mxu0 %v368_v51  ;;  %974 = vmatprep.subr.bf16.mxu1 %v1737_v22 }
  0x50   : > { %1532 = vmatpush3.bf16.msra.mxu0 %v1750_v45 }
  0x52   : > { %975 = vmatpush1.bf16.msra.mxu1 %v1739_v0 }
  0x53   : > { %976 = vmatprep.subr.bf16.mxu1 %v1740_v24 }
  0x56   : > { %628 = vmatmul.mubr.bf16.gmra.mrb[4].mxu0 %v334_v27  ;;  %v376_v27 = vld [vmem:[#allocation2 + $0x58] sm:$0xff]  ;;  %977 = vmatpush1.bf16.msra.mxu1 %v1742_v33 }
  0x57   : > { %637 = vmatprep.mubr.bf16.mxu0 %v370_v58 }
  0x5e   : > { %638 = vmatmul.mubr.bf16.gmra.mrb[8].mxu0 %v336_v37  ;;  %v1743_v37 = vld [vmem:[%s2490_s3 + $0xe4] ss:$8 sps:$4 sm:$0xff]  }
  0x5f   : > { %647 = vmatprep.mubr.bf16.mxu0 %v372_v62  ;;  %978 = vmatprep.subr.bf16.mxu1 %v1743_v37 }
  0x60   : > { %979 = vmatpush1.bf16.msra.mxu1 %v1745_v39 }
  0x61   : > { %980 = vmatprep.subr.bf16.mxu1 %v1746_v40 }
  0x66   : > { %648 = vmatmul.mubr.bf16.gmra.mrb[12].mxu0 %v338_v42  ;;  %v1748_v42 = vld [vmem:[%s2490_s3 + $0xf0] ss:$8 sps:$4 sm:$0xff]  }
  0x67   : > { %657 = vmatprep.mubr.bf16.mxu0 %v374_v25  ;;  %981 = vmatpush1.bf16.msra.mxu1 %v1748_v42 }
  0x68   : > { %1595 = vmatprep.subr.bf16.mxu1 %v1749_v44 }
  0x6e   : > { %658 = vmatmul.mubr.bf16.gmra.mrb[16].mxu0 %v340_v47  ;;  %v1751_v47 = vld [vmem:[%s2492_s5 + $0x48] sm:$0xff]  }
  0x6f   : > { %667 = vmatprep.mubr.bf16.mxu0 %v376_v27  ;;  %1533 = vmatprep.subr.bf16.mxu0 %v1751_v47 }
  0x70   : > { %1534 = vmatpush3.bf16.msra.mxu0 %v1752_v50 }
  0x71   : > { %1535 = vmatprep.subr.bf16.mxu0 %v1753_v53 }
  0x76   : > { %668 = vmatmul.mubr.bf16.gmra.mrb[20].mxu0 %v342_v57  ;;  %v2249_v57 = vld [vmem:[%s2492_s5 + $0x10] sm:$0xff]  }
  0x77   : > { %677 = vmatprep.mubr.bf16.mxu0 %v378_v2  ;;  %1536 = vmatpush3.bf16.msra.mxu0 %v2249_v57 }
  0x78   : > { %1537 = vmatprep.subr.bf16.mxu0 %v2254_v59 }
  0x7b   : > { %1538 = vmatpush3.bf16.msra.mxu0 %v2260_v60 }
  0x7e   : > { %678 = vmatmul.mubr.bf16.gmra.mrb[24].mxu0 %v344_v63  ;;  %v2266_v63 = vld [vmem:[%s2492_s5 + $0x60] sm:$0xff]  }
  0x7f   : > { %687 = vmatprep.mubr.bf16.mxu0 %v380_v30  ;;  %1539 = vmatprep.subr.bf16.mxu0 %v2266_v63 }
  0x80   : > { %1540 = vmatpush3.bf16.msra.mxu0 %v2272_v1 }
  0x81   : > { %1541 = vmatprep.subr.bf16.mxu0 %v2278_v3 }
  0x86   : > { %688 = vmatmul.mubr.bf16.gmra.mrb[28].mxu0 %v346_v4  ;;  %v415_v4 = vlaneseq }
  0x88   : > { %v2282_v5 = vshrl.u32 %v415_v4, 7 }
  0x8a   : > { %v417_v6 = vsub.s32 0, %v2282_v5  ;;  %v421_v8 = vsub.s32 1, %v2282_v5 }
  0x8c   : > { %v2291_v9 = vrot.slane %v413_v7, %v417_v6  ;;  %v2295_v10 = vrot.slane %v413_v7, %v421_v8 }
 0x121   : > { %v619_v11 = vpop.f32.mrb[0].mxu0 }
 0x122   : > { %v620_v12 = vadd.f32 %v619_v11, %v2291_v9  ;;  %v621_v13 = vpop.f32.mrb[1].mxu0 }
 0x123   : > { %v622_v14 = vadd.f32 %v621_v13, %v2295_v10  ;;  %v623_v15 = vpop.f32.mrb[2].mxu0 }
 0x124   : > { %v624_v16 = vadd.f32 %v623_v15, %v2291_v9  ;;  %v625_v17 = vpop.f32.mrb[3].mxu0  ;;  %v698_v21 = vmax.f32 %v620_v12, 0.0 }
 0x125   : > { %v626_v18 = vadd.f32 %v625_v17, %v2295_v10  ;;  %v699_v26 = vmax.f32 %v622_v14, 0.0 }
 0x126   : > { %v700_v23 = vmax.f32 %v624_v16, 0.0 }
 0x127   : > { %v701_v28 = vmax.f32 %v626_v18, 0.0 }
 0x128   : > { %v730_v29 = vpack.c.bf16 %v700_v23, %v698_v21 }
 0x129   : > { %v629_v31 = vpop.f32.mrb[4].mxu0  ;;  %v731_v32 = vpack.c.bf16 %v701_v28, %v699_v26 }
 0x12a   : > { %v630_v34 = vadd.f32 %v629_v31, %v2291_v9  ;;  %v631_v35 = vpop.f32.mrb[5].mxu0 }
 0x12b   : > { %v632_v36 = vadd.f32 %v631_v35, %v2295_v10  ;;  %v633_v38 = vpop.f32.mrb[6].mxu0  ;;  %982 = vmatprep.mubr.bf16.mxu1 %v731_v32 }
 0x12c   : > { %v634_v41 = vadd.f32 %v633_v38, %v2291_v9  ;;  %v635_v43 = vpop.f32.mrb[7].mxu0  ;;  %983 = vmatmul.mubr.bf16.vlgmr.msra.gmra.mrb[0].mxu1 %v730_v29  ;;  %v702_v48 = vmax.f32 %v630_v34, 0.0 }
 0x12d   : > { %v636_v46 = vadd.f32 %v635_v43, %v2295_v10  ;;  %1603 = vmatpush3.bf16.msra.mxu1 %v1750_v45  ;;  %v703_v51 = vmax.f32 %v632_v36, 0.0 }
 0x12e   : > { %v704_v49 = vmax.f32 %v634_v41, 0.0  ;;  %1596 = vmatprep.subr.bf16.mxu1 %v1751_v47 }
 0x12f   : > { %v705_v52 = vmax.f32 %v636_v46, 0.0 }
 0x130   : > { %v732_v54 = vpack.c.bf16 %v704_v49, %v702_v48 }
 0x131   : > { %v733_v55 = vpack.c.bf16 %v705_v52, %v703_v51  ;;  %v639_v56 = vpop.f32.mrb[8].mxu0  ;;  %1604 = vmatpush3.bf16.msra.mxu1 %v1752_v50 }
 0x132   : > { %v640_v58 = vadd.f32 %v639_v56, %v2291_v9  ;;  %v641_v61 = vpop.f32.mrb[9].mxu0  ;;  %1597 = vmatprep.subr.bf16.mxu1 %v1753_v53 }
 0x133   : > { %v642_v19 = vadd.f32 %v641_v61, %v2295_v10  ;;  %v643_v20 = vpop.f32.mrb[10].mxu0  ;;  %992 = vmatprep.mubr.bf16.mxu1 %v733_v55 }
 0x134   : > { %v644_v22 = vadd.f32 %v643_v20, %v2291_v9  ;;  %v645_v62 = vpop.f32.mrb[11].mxu0  ;;  %993 = vmatmul.mubr.bf16.gmra.mrb[4].mxu1 %v732_v54  ;;  %v706_v24 = vmax.f32 %v640_v58, 0.0 }
 0x135   : > { %v646_v0 = vadd.f32 %v645_v62, %v2295_v10  ;;  %1605 = vmatpush3.bf16.msra.mxu1 %v2249_v57  ;;  %v707_v27 = vmax.f32 %v642_v19, 0.0 }
 0x136   : > { %v708_v25 = vmax.f32 %v644_v22, 0.0  ;;  %1598 = vmatprep.subr.bf16.mxu1 %v2254_v59 }
 0x137   : > { %v709_v2 = vmax.f32 %v646_v0, 0.0 }
 0x138   : > { %v734_v30 = vpack.c.bf16 %v708_v25, %v706_v24 }
 0x139   : > { %v735_v33 = vpack.c.bf16 %v709_v2, %v707_v27  ;;  %v649_v37 = vpop.f32.mrb[12].mxu0  ;;  %1606 = vmatpush3.bf16.msra.mxu1 %v2260_v60 }
 0x13a   : > { %v650_v39 = vadd.f32 %v649_v37, %v2291_v9  ;;  %v651_v40 = vpop.f32.mrb[13].mxu0  ;;  %1599 = vmatprep.subr.bf16.mxu1 %v2266_v63 }
 0x13b   : > { %v652_v42 = vadd.f32 %v651_v40, %v2295_v10  ;;  %v653_v44 = vpop.f32.mrb[14].mxu0  ;;  %1002 = vmatprep.mubr.bf16.mxu1 %v735_v33 }
 0x13c   : > { %v654_v45 = vadd.f32 %v653_v44, %v2291_v9  ;;  %v655_v47 = vpop.f32.mrb[15].mxu0  ;;  %1003 = vmatmul.mubr.bf16.gmra.mrb[8].mxu1 %v734_v30  ;;  %v710_v53 = vmax.f32 %v650_v39, 0.0 }
 0x13d   : > { %v656_v50 = vadd.f32 %v655_v47, %v2295_v10  ;;  %1607 = vmatpush3.bf16.msra.mxu1 %v2272_v1  ;;  %v711_v59 = vmax.f32 %v652_v42, 0.0 }
 0x13e   : > { %v712_v57 = vmax.f32 %v654_v45, 0.0  ;;  %1600 = vmatprep.subr.bf16.mxu1 %v2278_v3 }
 0x13f   : > { %v713_v60 = vmax.f32 %v656_v50, 0.0 }
 0x140   : > { %v736_v4 = vpack.c.bf16 %v712_v57, %v710_v53 }
 0x141   : > { %v737_v63 = vpack.c.bf16 %v713_v60, %v711_v59  ;;  %v659_v7 = vpop.f32.mrb[16].mxu0  ;;  %v1760_v60 = vld [vmem:[%s2492_s5 + $0x28] sm:$0xff]  }
 0x142   : > { %v660_v11 = vadd.f32 %v659_v7, %v2291_v9  ;;  %v661_v12 = vpop.f32.mrb[17].mxu0  ;;  %1542 = vmatpush3.bf16.msra.mxu0 %v1760_v60  ;;  %1608 = vmatpush3.bf16.msra.mxu1 %v1760_v60  ;;  %v778_v7 = vld [vmem:[%s2491_s4] sm:$0x3] }
 0x143   : > { %v662_v13 = vadd.f32 %v661_v12, %v2295_v10  ;;  %v663_v14 = vpop.f32.mrb[18].mxu0  ;;  %1012 = vmatprep.mubr.bf16.mxu1 %v737_v63  ;;  %v1764_v63 = vld [vmem:[%s2492_s5 + $0x38] sm:$0xff]   ;;  %v2359_v12 = vrot.slane %v778_v7, %v421_v8 }
 0x144   : > { %v664_v15 = vadd.f32 %v663_v14, %v2291_v9  ;;  %v665_v16 = vpop.f32.mrb[19].mxu0  ;;  %1013 = vmatmul.mubr.bf16.gmra.mrb[12].mxu1 %v736_v4  ;;  %v714_v17 = vmax.f32 %v660_v11, 0.0  ;;  %v1763_v4 = vld [vmem:[%s2492_s5 + $0x78] sm:$0xff]   ;;  %v2355_v11 = vrot.slane %v778_v7, %v417_v6 }
 0x145   : > { %v666_v1 = vadd.f32 %v665_v16, %v2295_v10  ;;  %v715_v18 = vmax.f32 %v662_v13, 0.0 }
 0x146   : > { %v716_v3 = vmax.f32 %v664_v15, 0.0 }
 0x147   : > { %v717_v21 = vmax.f32 %v666_v1, 0.0 }
 0x148   : > { %v738_v23 = vpack.c.bf16 %v716_v3, %v714_v17 }
 0x149   : > { %v739_v26 = vpack.c.bf16 %v717_v21, %v715_v18  ;;  %v669_v28 = vpop.f32.mrb[20].mxu0 }
 0x14a   : > { %v670_v29 = vadd.f32 %v669_v28, %v2291_v9  ;;  %v671_v31 = vpop.f32.mrb[21].mxu0 }
 0x14b   : > { %v672_v32 = vadd.f32 %v671_v31, %v2295_v10  ;;  %v673_v34 = vpop.f32.mrb[22].mxu0  ;;  %1022 = vmatprep.mubr.bf16.mxu1 %v739_v26 }
 0x14c   : > { %v674_v35 = vadd.f32 %v673_v34, %v2291_v9  ;;  %v675_v36 = vpop.f32.mrb[23].mxu0  ;;  %1023 = vmatmul.mubr.bf16.gmra.mrb[16].mxu1 %v738_v23  ;;  %v718_v41 = vmax.f32 %v670_v29, 0.0 }
 0x14d   : > { %v676_v38 = vadd.f32 %v675_v36, %v2295_v10  ;;  %v719_v46 = vmax.f32 %v672_v32, 0.0 }
 0x14e   : > { %v720_v43 = vmax.f32 %v674_v35, 0.0 }
 0x14f   : > { %v721_v48 = vmax.f32 %v676_v38, 0.0 }
 0x150   : > { %v740_v49 = vpack.c.bf16 %v720_v43, %v718_v41 }
 0x151   : > { %v741_v51 = vpack.c.bf16 %v721_v48, %v719_v46  ;;  %v679_v52 = vpop.f32.mrb[24].mxu0 }
 0x152   : > { %v680_v54 = vadd.f32 %v679_v52, %v2291_v9  ;;  %v681_v55 = vpop.f32.mrb[25].mxu0 }
 0x153   : > { %v682_v56 = vadd.f32 %v681_v55, %v2295_v10  ;;  %v683_v58 = vpop.f32.mrb[26].mxu0  ;;  %1032 = vmatprep.mubr.bf16.mxu1 %v741_v51 }
 0x154   : > { %v684_v61 = vadd.f32 %v683_v58, %v2291_v9  ;;  %v685_v19 = vpop.f32.mrb[27].mxu0  ;;  %1033 = vmatmul.mubr.bf16.gmra.mrb[20].mxu1 %v740_v49  ;;  %v722_v22 = vmax.f32 %v680_v54, 0.0 }
 0x155   : > { %v686_v20 = vadd.f32 %v685_v19, %v2295_v10  ;;  %v723_v0 = vmax.f32 %v682_v56, 0.0 }
 0x156   : > { %v724_v62 = vmax.f32 %v684_v61, 0.0 }
 0x157   : > { %v725_v24 = vmax.f32 %v686_v20, 0.0 }
 0x158   : > { %v742_v25 = vpack.c.bf16 %v724_v62, %v722_v22 }
 0x159   : > { %v743_v27 = vpack.c.bf16 %v725_v24, %v723_v0  ;;  %v689_v2 = vpop.f32.mrb[28].mxu0 }
 0x15a   : > { %v690_v30 = vadd.f32 %v689_v2, %v2291_v9  ;;  %v691_v33 = vpop.f32.mrb[29].mxu0 }
 0x15b   : > { %v692_v37 = vadd.f32 %v691_v33, %v2295_v10  ;;  %v693_v39 = vpop.f32.mrb[30].mxu0  ;;  %1042 = vmatprep.mubr.bf16.mxu1 %v743_v27 }
 0x15c   : > { %v694_v40 = vadd.f32 %v693_v39, %v2291_v9  ;;  %v695_v42 = vpop.f32.mrb[31].mxu0  ;;  %1043 = vmatmul.mubr.bf16.gmra.mrb[24].mxu1 %v742_v25  ;;  %v726_v45 = vmax.f32 %v690_v30, 0.0  ;;  %v1761_v9 = vld [vmem:[%s2492_s5 + $0x70] sm:$0xff]  }
 0x15d   : > { %v696_v44 = vadd.f32 %v695_v42, %v2295_v10  ;;  %v727_v50 = vmax.f32 %v692_v37, 0.0  ;;  %v1762_v10 = vld [vmem:[%s2492_s5 + $0x30] sm:$0xff]   ;;  %1543 = vmatprep.subr.bf16.mxu0 %v1761_v9  ;;  %1601 = vmatprep.subr.bf16.mxu1 %v1761_v9 }
 0x15e   : > { %v728_v47 = vmax.f32 %v694_v40, 0.0  ;;  %1544 = vmatpush3.bf16.msra.mxu0 %v1762_v10  ;;  %1609 = vmatpush3.bf16.msra.mxu1 %v1762_v10 }
 0x15f   : > { %v729_v53 = vmax.f32 %v696_v44, 0.0  ;;  %1545 = vmatprep.subr.bf16.mxu0 %v1763_v4  ;;  %1602 = vmatprep.subr.bf16.mxu1 %v1763_v4 }
 0x160   : > { %v744_v57 = vpack.c.bf16 %v728_v47, %v726_v45 }
 0x161   : > { %v745_v59 = vpack.c.bf16 %v729_v53, %v727_v50 }
 0x162   : > { %1546 = vmatpush3.bf16.msra.mxu0 %v1764_v63  ;;  %1610 = vmatpush3.bf16.msra.mxu1 %v1764_v63 }
 0x163   : > { %1052 = vmatprep.mubr.bf16.mxu1 %v745_v59 }
 0x164   : > { %1053 = vmatmul.mubr.bf16.gmra.mrb[28].mxu1 %v744_v57 }
 0x1ff   : > { %v984_v13 = vpop.f32.mrb[0].mxu1 }
 0x200   : > { %v985_v14 = vadd.f32 %v984_v13, %v2355_v11  ;;  %v986_v15 = vpop.f32.mrb[1].mxu1 }
 0x201   : > { %v987_v16 = vadd.f32 %v986_v15, %v2359_v12  ;;  %v988_v1 = vpop.f32.mrb[2].mxu1 }
 0x202   : > { %v989_v17 = vadd.f32 %v988_v1, %v2355_v11  ;;  %v990_v3 = vpop.f32.mrb[3].mxu1  ;;  %v1063_v21 = vmax.f32 %v985_v14, 0.0 }
 0x203   : > { %v991_v18 = vadd.f32 %v990_v3, %v2359_v12  ;;  %v1064_v6 = vmax.f32 %v987_v16, 0.0 }
 0x204   : > { %v1065_v23 = vmax.f32 %v989_v17, 0.0 }
 0x205   : > { %v1066_v26 = vmax.f32 %v991_v18, 0.0 }
 0x206   : > { %v1095_v28 = vpack.c.bf16 %v1065_v23, %v1063_v21 }
 0x207   : > { %v1096_v5 = vpack.c.bf16 %v1066_v26, %v1064_v6  ;;  %v994_v8 = vpop.f32.mrb[4].mxu1 }
 0x208   : > { %v995_v29 = vadd.f32 %v994_v8, %v2355_v11  ;;  %v996_v31 = vpop.f32.mrb[5].mxu1 }
 0x209   : > { %v997_v32 = vadd.f32 %v996_v31, %v2359_v12  ;;  %v998_v34 = vpop.f32.mrb[6].mxu1  ;;  %1278 = vmatprep.mubr.bf16.mxu0 %v1096_v5 }
 0x20a   : > { %v999_v35 = vadd.f32 %v998_v34, %v2355_v11  ;;  %v1000_v36 = vpop.f32.mrb[7].mxu1  ;;  %1279 = vmatmul.mubr.bf16.vlgmr.msra.gmra.mrb[32].mxu0 %v1095_v28  ;;  %v1067_v41 = vmax.f32 %v995_v29, 0.0 }
 0x20b   : > { %v1001_v38 = vadd.f32 %v1000_v36, %v2359_v12  ;;  %v1068_v46 = vmax.f32 %v997_v32, 0.0 }
 0x20c   : > { %v1069_v43 = vmax.f32 %v999_v35, 0.0 }
 0x20d   : > { %v1070_v48 = vmax.f32 %v1001_v38, 0.0 }
 0x20e   : > { %v1097_v49 = vpack.c.bf16 %v1069_v43, %v1067_v41 }
 0x20f   : > { %v1098_v51 = vpack.c.bf16 %v1070_v48, %v1068_v46  ;;  %v1004_v52 = vpop.f32.mrb[8].mxu1 }
 0x210   : > { %v1005_v54 = vadd.f32 %v1004_v52, %v2355_v11  ;;  %v1006_v55 = vpop.f32.mrb[9].mxu1 }
 0x211   : > { %v1007_v56 = vadd.f32 %v1006_v55, %v2359_v12  ;;  %v1008_v58 = vpop.f32.mrb[10].mxu1  ;;  %1286 = vmatprep.mubr.bf16.mxu0 %v1098_v51 }
 0x212   : > { %v1009_v61 = vadd.f32 %v1008_v58, %v2355_v11  ;;  %v1010_v19 = vpop.f32.mrb[11].mxu1  ;;  %1287 = vmatmul.mubr.bf16.gmra.mrb[36].mxu0 %v1097_v49  ;;  %v1071_v22 = vmax.f32 %v1005_v54, 0.0 }
 0x213   : > { %v1011_v20 = vadd.f32 %v1010_v19, %v2359_v12  ;;  %v1072_v0 = vmax.f32 %v1007_v56, 0.0 }
 0x214   : > { %v1073_v62 = vmax.f32 %v1009_v61, 0.0 }
 0x215   : > { %v1074_v24 = vmax.f32 %v1011_v20, 0.0 }
 0x216   : > { %v1099_v25 = vpack.c.bf16 %v1073_v62, %v1071_v22 }
 0x217   : > { %v1100_v27 = vpack.c.bf16 %v1074_v24, %v1072_v0  ;;  %v1014_v2 = vpop.f32.mrb[12].mxu1 }
 0x218   : > { %v1015_v30 = vadd.f32 %v1014_v2, %v2355_v11  ;;  %v1016_v33 = vpop.f32.mrb[13].mxu1 }
 0x219   : > { %v1017_v37 = vadd.f32 %v1016_v33, %v2359_v12  ;;  %v1018_v39 = vpop.f32.mrb[14].mxu1  ;;  %1294 = vmatprep.mubr.bf16.mxu0 %v1100_v27 }
 0x21a   : > { %v1019_v40 = vadd.f32 %v1018_v39, %v2355_v11  ;;  %v1020_v42 = vpop.f32.mrb[15].mxu1  ;;  %1295 = vmatmul.mubr.bf16.gmra.mrb[40].mxu0 %v1099_v25  ;;  %v1075_v45 = vmax.f32 %v1015_v30, 0.0 }
 0x21b   : > { %v1021_v44 = vadd.f32 %v1020_v42, %v2359_v12  ;;  %v1076_v50 = vmax.f32 %v1017_v37, 0.0 }
 0x21c   : > { %v1077_v47 = vmax.f32 %v1019_v40, 0.0 }
 0x21d   : > { %v1078_v53 = vmax.f32 %v1021_v44, 0.0 }
 0x21e   : > { %v1101_v57 = vpack.c.bf16 %v1077_v47, %v1075_v45 }
 0x21f   : > { %v1102_v59 = vpack.c.bf16 %v1078_v53, %v1076_v50  ;;  %v1024_v60 = vpop.f32.mrb[16].mxu1 }
 0x220   : > { %v1025_v9 = vadd.f32 %v1024_v60, %v2355_v11  ;;  %v1026_v10 = vpop.f32.mrb[17].mxu1 }
 0x221   : > { %v1027_v4 = vadd.f32 %v1026_v10, %v2359_v12  ;;  %v1028_v63 = vpop.f32.mrb[18].mxu1  ;;  %1302 = vmatprep.mubr.bf16.mxu0 %v1102_v59 }
 0x222   : > { %v1029_v7 = vadd.f32 %v1028_v63, %v2355_v11  ;;  %v1030_v13 = vpop.f32.mrb[19].mxu1  ;;  %1303 = vmatmul.mubr.bf16.gmra.mrb[44].mxu0 %v1101_v57  ;;  %v1079_v15 = vmax.f32 %v1025_v9, 0.0 }
 0x223   : > { %v1031_v14 = vadd.f32 %v1030_v13, %v2359_v12  ;;  %v1080_v1 = vmax.f32 %v1027_v4, 0.0 }
 0x224   : > { %v1081_v16 = vmax.f32 %v1029_v7, 0.0 }
 0x225   : > { %v1082_v17 = vmax.f32 %v1031_v14, 0.0 }
 0x226   : > { %v1103_v3 = vpack.c.bf16 %v1081_v16, %v1079_v15 }
 0x227   : > { %v1104_v18 = vpack.c.bf16 %v1082_v17, %v1080_v1  ;;  %v1034_v21 = vpop.f32.mrb[20].mxu1 }
 0x228   : > { %v1035_v23 = vadd.f32 %v1034_v21, %v2355_v11  ;;  %v1036_v6 = vpop.f32.mrb[21].mxu1 }
 0x229   : > { %v1037_v26 = vadd.f32 %v1036_v6, %v2359_v12  ;;  %v1038_v28 = vpop.f32.mrb[22].mxu1  ;;  %1310 = vmatprep.mubr.bf16.mxu1 %v1104_v18 }
 0x22a   : > { %v1039_v5 = vadd.f32 %v1038_v28, %v2355_v11  ;;  %v1040_v8 = vpop.f32.mrb[23].mxu1  ;;  %1311 = vmatmul.mubr.bf16.vlgmr.msra.gmra.mrb[32].mxu1 %v1103_v3  ;;  %v1083_v31 = vmax.f32 %v1035_v23, 0.0 }
 0x22b   : > { %v1041_v29 = vadd.f32 %v1040_v8, %v2359_v12  ;;  %v1084_v34 = vmax.f32 %v1037_v26, 0.0 }
 0x22c   : > { %v1085_v32 = vmax.f32 %v1039_v5, 0.0 }
 0x22d   : > { %v1086_v35 = vmax.f32 %v1041_v29, 0.0 }
 0x22e   : > { %v1105_v36 = vpack.c.bf16 %v1085_v32, %v1083_v31 }
 0x22f   : > { %v1106_v38 = vpack.c.bf16 %v1086_v35, %v1084_v34  ;;  %v1044_v41 = vpop.f32.mrb[24].mxu1 }
 0x230   : > { %v1045_v43 = vadd.f32 %v1044_v41, %v2355_v11  ;;  %v1046_v46 = vpop.f32.mrb[25].mxu1 }
 0x231   : > { %v1047_v48 = vadd.f32 %v1046_v46, %v2359_v12  ;;  %v1048_v49 = vpop.f32.mrb[26].mxu1  ;;  %1318 = vmatprep.mubr.bf16.mxu1 %v1106_v38 }
 0x232   : > { %v1049_v51 = vadd.f32 %v1048_v49, %v2355_v11  ;;  %v1050_v52 = vpop.f32.mrb[27].mxu1  ;;  %1319 = vmatmul.mubr.bf16.gmra.mrb[36].mxu1 %v1105_v36  ;;  %v1087_v55 = vmax.f32 %v1045_v43, 0.0 }
 0x233   : > { %v1051_v54 = vadd.f32 %v1050_v52, %v2359_v12  ;;  %v1088_v58 = vmax.f32 %v1047_v48, 0.0 }
 0x234   : > { %v1089_v56 = vmax.f32 %v1049_v51, 0.0 }
 0x235   : > { %v1090_v61 = vmax.f32 %v1051_v54, 0.0 }
 0x236   : > { %v1107_v19 = vpack.c.bf16 %v1089_v56, %v1087_v55 }
 0x237   : > { %v1108_v20 = vpack.c.bf16 %v1090_v61, %v1088_v58  ;;  %v1054_v22 = vpop.f32.mrb[28].mxu1 }
 0x238   : > { %v1055_v62 = vadd.f32 %v1054_v22, %v2355_v11  ;;  %v1056_v0 = vpop.f32.mrb[29].mxu1 }
 0x239   : > { %v1057_v24 = vadd.f32 %v1056_v0, %v2359_v12  ;;  %v1058_v25 = vpop.f32.mrb[30].mxu1  ;;  %1326 = vmatprep.mubr.bf16.mxu1 %v1108_v20 }
 0x23a   : > { %v1059_v27 = vadd.f32 %v1058_v25, %v2355_v11  ;;  %v1060_v2 = vpop.f32.mrb[31].mxu1  ;;  %1327 = vmatmul.mubr.bf16.gmra.mrb[40].mxu1 %v1107_v19  ;;  %v1091_v33 = vmax.f32 %v1055_v62, 0.0  ;;  %v2399_v11 = vld [vmem:[%s2493_s6] ss:$0 sm:$0xff] }
 0x23b   : > { %v1061_v30 = vadd.f32 %v1060_v2, %v2359_v12  ;;  %v1092_v39 = vmax.f32 %v1057_v24, 0.0 }
 0x23c   : > { %v1093_v37 = vmax.f32 %v1059_v27, 0.0 }
 0x23d   : > { %v1094_v40 = vmax.f32 %v1061_v30, 0.0 }
 0x23e   : > { %v1109_v42 = vpack.c.bf16 %v1093_v37, %v1091_v33 }
 0x23f   : > { %v1110_v44 = vpack.c.bf16 %v1094_v40, %v1092_v39 }
 0x241   : > { %1334 = vmatprep.mubr.bf16.mxu1 %v1110_v44 }
 0x242   : > { %1335 = vmatmul.mubr.bf16.gmra.mrb[44].mxu1 %v1109_v42 }
 0x2dd   : > { %v1547_v45 = vpop.f32.mrb[32].mxu0 }
 0x2de   : > { %v1548_v47 = vpop.f32.mrb[33].mxu0 }
 0x2df   : > { %v1549_v50 = vadd.f32 %v1548_v47, %v1547_v45  ;;  %v1550_v12 = vpop.f32.mrb[34].mxu0 }
 0x2e0   : > { %v1551_v53 = vpop.f32.mrb[35].mxu0 }
 0x2e1   : > { %v1281_v57 = vadd.f32 %v1549_v50, %v2399_v11  ;;  %v1552_v59 = vadd.f32 %v1551_v53, %v1550_v12 }
 0x2e3   : > { %1343 = vst [vmem:[%s2402_s19] sm:$0xff] %v1281_v57  ;;  %v1284_v60 = vadd.f32 %v1552_v59, %v2399_v11 }
 0x2e5   : > { %1344 = vst [vmem:[%s2402_s19 + $0x8] sm:$0xff] %v1284_v60  ;;  %v1553_v9 = vpop.f32.mrb[36].mxu0 }
 0x2e6   : > { %v1554_v10 = vpop.f32.mrb[37].mxu0 }
 0x2e7   : > { %v1555_v4 = vadd.f32 %v1554_v10, %v1553_v9  ;;  %v1556_v63 = vpop.f32.mrb[38].mxu0 }
 0x2e8   : > { %v1557_v7 = vpop.f32.mrb[39].mxu0 }
 0x2e9   : > { %v1289_v13 = vadd.f32 %v1555_v4, %v2399_v11  ;;  %v1558_v14 = vadd.f32 %v1557_v7, %v1556_v63 }
 0x2eb   : > { %1345 = vst [vmem:[%s2402_s19 + $0x10] sm:$0xff] %v1289_v13  ;;  %v1292_v15 = vadd.f32 %v1558_v14, %v2399_v11 }
 0x2ed   : > { %1346 = vst [vmem:[%s2402_s19 + $0x18] sm:$0xff] %v1292_v15  ;;  %v1559_v16 = vpop.f32.mrb[40].mxu0 }
 0x2ee   : > { %v1560_v1 = vpop.f32.mrb[41].mxu0 }
 0x2ef   : > { %v1561_v17 = vadd.f32 %v1560_v1, %v1559_v16  ;;  %v1562_v3 = vpop.f32.mrb[42].mxu0 }
 0x2f0   : > { %v1563_v18 = vpop.f32.mrb[43].mxu0 }
 0x2f1   : > { %v1297_v21 = vadd.f32 %v1561_v17, %v2399_v11  ;;  %v1564_v23 = vadd.f32 %v1563_v18, %v1562_v3 }
 0x2f3   : > { %1347 = vst [vmem:[%s2402_s19 + $0x20] sm:$0xff] %v1297_v21  ;;  %v1300_v6 = vadd.f32 %v1564_v23, %v2399_v11 }
 0x2f5   : > { %1348 = vst [vmem:[%s2402_s19 + $0x28] sm:$0xff] %v1300_v6  ;;  %v1565_v26 = vpop.f32.mrb[44].mxu0 }
 0x2f6   : > { %v1566_v28 = vpop.f32.mrb[45].mxu0 }
 0x2f7   : > { %v1567_v5 = vadd.f32 %v1566_v28, %v1565_v26  ;;  %v1568_v8 = vpop.f32.mrb[46].mxu0 }
 0x2f8   : > { %v1569_v29 = vpop.f32.mrb[47].mxu0 }
 0x2f9   : > { %v1305_v31 = vadd.f32 %v1567_v5, %v2399_v11  ;;  %v1570_v32 = vadd.f32 %v1569_v29, %v1568_v8 }
 0x2fb   : > { %1349 = vst [vmem:[%s2402_s19 + $0x30] sm:$0xff] %v1305_v31  ;;  %v1308_v34 = vadd.f32 %v1570_v32, %v2399_v11 }
 0x2fd   : > { %1350 = vst [vmem:[%s2402_s19 + $0x38] sm:$0xff] %v1308_v34  ;;  %v1571_v35 = vpop.f32.mrb[32].mxu1 }
 0x2fe   : > { %v1572_v36 = vpop.f32.mrb[33].mxu1 }
 0x2ff   : > { %v1573_v38 = vadd.f32 %v1572_v36, %v1571_v35  ;;  %v1574_v41 = vpop.f32.mrb[34].mxu1 }
 0x300   : > { %v1575_v43 = vpop.f32.mrb[35].mxu1 }
 0x301   : > { %v1313_v46 = vadd.f32 %v1573_v38, %v2399_v11  ;;  %v1576_v48 = vadd.f32 %v1575_v43, %v1574_v41 }
 0x303   : > { %1351 = vst [vmem:[%s2402_s19 + $0x40] sm:$0xff] %v1313_v46  ;;  %v1316_v49 = vadd.f32 %v1576_v48, %v2399_v11 }
 0x305   : > { %1352 = vst [vmem:[%s2402_s19 + $0x48] sm:$0xff] %v1316_v49  ;;  %v1577_v51 = vpop.f32.mrb[36].mxu1 }
 0x306   : > { %v1578_v52 = vpop.f32.mrb[37].mxu1 }
 0x307   : > { %v1579_v54 = vadd.f32 %v1578_v52, %v1577_v51  ;;  %v1580_v55 = vpop.f32.mrb[38].mxu1 }
 0x308   : > { %v1581_v56 = vpop.f32.mrb[39].mxu1 }
 0x309   : > { %v1321_v58 = vadd.f32 %v1579_v54, %v2399_v11  ;;  %v1582_v61 = vadd.f32 %v1581_v56, %v1580_v55 }
 0x30b   : > { %1353 = vst [vmem:[%s2402_s19 + $0x50] sm:$0xff] %v1321_v58  ;;  %v1324_v19 = vadd.f32 %v1582_v61, %v2399_v11 }
 0x30d   : > { %1354 = vst [vmem:[%s2402_s19 + $0x58] sm:$0xff] %v1324_v19  ;;  %v1583_v20 = vpop.f32.mrb[40].mxu1 }
 0x30e   : > { %v1584_v22 = vpop.f32.mrb[41].mxu1 }
 0x30f   : > { %v1585_v62 = vadd.f32 %v1584_v22, %v1583_v20  ;;  %v1586_v0 = vpop.f32.mrb[42].mxu1 }
 0x310   : > { %v1587_v24 = vpop.f32.mrb[43].mxu1 }
 0x311   : > { %v1329_v25 = vadd.f32 %v1585_v62, %v2399_v11  ;;  %v1588_v27 = vadd.f32 %v1587_v24, %v1586_v0 }
 0x313   : > { %1355 = vst [vmem:[%s2402_s19 + $0x60] sm:$0xff] %v1329_v25  ;;  %v1332_v2 = vadd.f32 %v1588_v27, %v2399_v11 }
 0x315   : > { %1356 = vst [vmem:[%s2402_s19 + $0x68] sm:$0xff] %v1332_v2  ;;  %v1589_v30 = vpop.f32.mrb[44].mxu1 }
 0x316   : > { %v1590_v33 = vpop.f32.mrb[45].mxu1 }
 0x317   : > { %v1591_v37 = vadd.f32 %v1590_v33, %v1589_v30  ;;  %v1592_v39 = vpop.f32.mrb[46].mxu1 }
 0x318   : > { %v1593_v40 = vpop.f32.mrb[47].mxu1 }
 0x319   : > { %v1337_v42 = vadd.f32 %v1591_v37, %v2399_v11  ;;  %v1594_v44 = vadd.f32 %v1593_v40, %v1592_v39 }
 0x31b   : > { %1357 = vst [vmem:[%s2402_s19 + $0x70] sm:$0xff] %v1337_v42  ;;  %v1340_v45 = vadd.f32 %v1594_v44, %v2399_v11 }
 0x31d   : > { %1358 = vst [vmem:[%s2402_s19 + $0x78] sm:$0xff] %v1340_v45 }
 0x31e   : > { %1778 = shalt.err (!%p1775_p3)
}
 0x31f   : > { %s1779_s15 = scalar_lea.hbm %s2437_s29, 2048  ;;  %s1783_s18 = scalar_lea.hbm %s2494_s7, 4096 }
 0x320   : > { %p1780_p4 = scmp.ne.s32.totalorder %s2437_s29, %s1779_s15  ;;  %p1784_p9 = scmp.lt.u32.totalorder %s2437_s29, %s2494_s7 }
 0x321   : > { %p1785_p10 = scmp.lt.u32.totalorder %s1783_s18, %s1779_s15  ;;  %p1787_p12 = scmp.lt.u32.totalorder %s1779_s15, %s2437_s29 }
 0x322   : > { %p1781_p7 = pnand %p1780_p4, %p1911_p5 }
 0x323   : > { %p1786_p11 = por %p1785_p10, %p1784_p9 }
 0x324   : > { %p1782_p8 = pneg %p1781_p7 }
 0x325   : > { %p1788_p13 = por %p1787_p12, %p1786_p11 }
 0x327   : > { %p1789_p0 = pnand %p1788_p13, %p1782_p8 }
 0x329   : > { %1792 = shalt.err (!%p1789_p0)
}
 0x32a   : > { %s1831_s21 = smov 128   ;;  %s1832_s22 = smov 8  }
 0x32b   : > { %1611 = dma.vmem_to_hbm [thread:$0]  (%p1911_p5), %s2439_s9, 2048, %s2437_s29, %s2446_s28, %s1831_s21, %s1831_s21, %s1832_s22  }
 0x32c PF: > { %p1617_p1 = scmp.ge.s32.totalorder %s1827_s27, 2  ;;  %s1388_s8 = sand.u32 1, %s1815_s24  }
 0x32d   : > { %s1389_s13 = scalar_lea.sflag [#allocation4], %s1388_s8 }
 0x32e   : > { %p1614_p2 = pnand %p1617_p1, %p1915_p6 }
 0x330   : > { %1810 = dma.done.wait (!%p1614_p2), %s1389_s13, 2048  }
 0x331   : > { %1812 = vsyncadd (!%p1614_p2), %s1389_s13, 4294965248  ;;  %p17_p3 = scmp.ge.s32.totalorder %s1898_s30, 4   ;;  %s2497_s24 = smov %s1819_s25 }
 0x332   : > { %s2498_s25 = smov %s1823_s26  ;;  %s2499_s26 = smov %s1909_s10 }
 0x333   : > { %s2500_s27 = smov %s1898_s30  ;;  %19 = sbr.rel (!%p17_p3) target bundleno = 3 (0x3), region = 83 }
 0x33a   :  { %1394 = vsyncpa [#allocation4], 1 }
 0x33b   :  { %1396 = vsyncpa [#allocation4 + $0x1], 1 }

</bundles_post_ra>
